<compile_context>
chip_gen: v6e
topology: v6e:2x2x1
jax: 0.10.0
libtpu: 0.0.40
codegen_flags: <defaults>
</compile_context>

<pallas_src>
import functools

import numpy as np

import jax
import jax.numpy as jnp
from jax import lax
from jax.experimental import pallas as pl
from jax.experimental.pallas import tpu as pltpu


# ---------------------------------------------------------------------------
# One-time probe: pin down pltpu.roll's rotation convention so the 3x3 tap
# shifts below are provably in the right direction on any backend version.
# ---------------------------------------------------------------------------
def _roll_matches_jnp_roll():
    def k(x_ref, o_ref):
        o_ref[...] = pltpu.roll(x_ref[...], 1, axis=1)

    x = jnp.tile(jnp.arange(128, dtype=jnp.float32)[None, :], (8, 1))
    y = pl.pallas_call(k, out_shape=jax.ShapeDtypeStruct((8, 128), jnp.float32))(x)
    return int(y[0, 0]) == 127          # jnp.roll(x, 1)[0] == x[-1]


# ---------------------------------------------------------------------------
# Fused per-layer ConvLSTM kernel
#   grid = (T,)  ("arbitrary": sequential recurrence)
#   x_ref  : [1, Ci, NS]          timestep input, NS = B*H*W (lane-dense)
#   w_ref  : [4*hid, 9*(Ci+hid)]  gate conv weights, tap-major K (resident)
#   b_ref  : [4*hid, 1]           gate bias (resident)
#   m_ref  : [9, NS]              0/1 boundary mask per tap (resident)
#   h_out  : [1, hid, NS]         per-timestep hidden output (lane-dense store)
#   h_scr / c_scr : VMEM [hid, NS] recurrent state, persists across grid steps
# ---------------------------------------------------------------------------
def _convlstm_layer_kernel(x_ref, w_ref, b_ref, m_ref, h_out_ref, h_scr, c_scr,
                           *, hid, shift_args, center):
    t = pl.program_id(0)

    @pl.when(t == 0)
    def _():
        h_scr[...] = jnp.zeros_like(h_scr)
        c_scr[...] = jnp.zeros_like(c_scr)

    # cat([x_t, h_{t-1}]) along channels, spatial axis stays lane-dense.
    comb = jnp.concatenate([x_ref[0], h_scr[...]], axis=0)        # [Cin, NS]

    # In-kernel im2col: each tap = lane roll (XLU slot) + boundary mask (VPU).
    taps = []
    for kk, sa in enumerate(shift_args):
        v = pltpu.roll(comb, sa, axis=1) if sa != 0 else comb
        if kk != center:
            v = v * m_ref[kk:kk + 1, :]
        taps.append(v)
    patches = jnp.concatenate(taps, axis=0)                       # [9*Cin, NS]

    # Gate GEMM on the MXU, bias fused.
    gates = jnp.dot(w_ref[...], patches,
                    preferred_element_type=jnp.float32) + b_ref[...]

    # Fused LSTM update (EUP sigmoid/tanh, lane-dense elementwise).
    i_g = jax.nn.sigmoid(gates[0 * hid:1 * hid])
    f_g = jax.nn.sigmoid(gates[1 * hid:2 * hid])
    o_g = jax.nn.sigmoid(gates[2 * hid:3 * hid])
    g_g = jnp.tanh(gates[3 * hid:4 * hid])

    c_new = f_g * c_scr[...] + i_g * g_g
    h_new = o_g * jnp.tanh(c_new)

    c_scr[...] = c_new
    h_scr[...] = h_new
    h_out_ref[0] = h_new


def convlstm_layer(x_seq, w, b, masks, H, W, roll_sign):
    """x_seq: [T, Ci, NS]; w: [4*hid, Ci+hid, 3, 3]; b: [4*hid] -> [T, hid, NS]."""
    T, ci, ns = x_seq.shape
    four_hid, cin, kh, kw = w.shape
    hid = four_hid // 4
    assert cin == ci + hid and (kh, kw) == (3, 3)

    # K laid out tap-major then channel, matching the in-kernel patch build.
    w_mat = w.transpose(0, 2, 3, 1).reshape(four_hid, 9 * cin)
    b_col = b.reshape(four_hid, 1)

    # Flat-spatial shift per tap; sign adapted to pltpu.roll's convention.
    shift_args = []
    for dh in (-1, 0, 1):
        for dw in (-1, 0, 1):
            shift_args.append((roll_sign * (dh * W + dw)) % ns)

    kernel = functools.partial(_convlstm_layer_kernel, hid=hid,
                               shift_args=tuple(shift_args), center=4)

    cost = pl.CostEstimate(
        flops=2 * T * four_hid * 9 * cin * ns,
        transcendentals=5 * T * hid * ns,
        bytes_accessed=4 * (x_seq.size + w_mat.size + b_col.size
                            + masks.size + T * hid * ns),
    )

    return pl.pallas_call(
        kernel,
        out_shape=jax.ShapeDtypeStruct((T, hid, ns), jnp.float32),
        grid=(T,),
        in_specs=[
            pl.BlockSpec((1, ci, ns), lambda t: (t, 0, 0)),
            pl.BlockSpec((four_hid, 9 * cin), lambda t: (0, 0)),
            pl.BlockSpec((four_hid, 1), lambda t: (0, 0)),
            pl.BlockSpec((9, ns), lambda t: (0, 0)),
        ],
        out_specs=pl.BlockSpec((1, hid, ns), lambda t: (t, 0, 0)),
        scratch_shapes=[pltpu.VMEM((hid, ns), jnp.float32),
                        pltpu.VMEM((hid, ns), jnp.float32)],
        compiler_params=pltpu.CompilerParams(
            dimension_semantics=("arbitrary",),
            vmem_limit_bytes=32 * 1024 * 1024),
        cost_estimate=cost,
    )(x_seq, w_mat, b_col, masks)


def _build_tap_masks(B, H, W):
    """[9, B*H*W] 0/1 masks: valid positions for each (dh, dw) tap of a 3x3 'same' conv."""
    ii, jj = np.meshgrid(np.arange(H), np.arange(W), indexing="ij")
    rows = []
    for dh in (-1, 0, 1):
        for dw in (-1, 0, 1):
            valid = ((ii + dh >= 0) & (ii + dh < H) &
                     (jj + dw >= 0) & (jj + dw < W)).astype(np.float32)
            rows.append(np.tile(valid.reshape(1, H * W), (B, 1)).reshape(-1))
    return jnp.asarray(np.stack(rows, axis=0))


def make_forward(H, W, roll_sign):
    @jax.jit
    def forward(X, params):
        """X: [B, T, 1, H, W] -> [B, T, hid_last, H, W]  (== pred[0] of convlstmNet)."""
        B, T, Ci = X.shape[0], X.shape[1], X.shape[2]
        ns = B * H * W
        masks = _build_tap_masks(B, H, W)
        # Lane-dense layout: [T, C, B*H*W]; one transpose in, one transpose out.
        cur = X.astype(jnp.float32).transpose(1, 2, 0, 3, 4).reshape(T, Ci, ns)
        for (w, b) in params:
            cur = convlstm_layer(cur, w, b, masks, H, W, roll_sign)
        hid_last = cur.shape[1]
        return cur.reshape(T, hid_last, B, H, W).transpose(2, 0, 1, 3, 4)
    return forward


# ---------------------------------------------------------------------------
# Deterministic parameter init (shapes of ConvLSTM cell convs: 4*hid x (Ci+hid) x 3 x 3)
# ---------------------------------------------------------------------------
def init_params(key, input_dim, inner_dims):
    params = []
    cin = input_dim
    for hid in inner_dims:
        key, k1, k2 = jax.random.split(key, 3)
        bound = 1.0 / np.sqrt((cin + hid) * 9)
        w = jax.random.uniform(k1, (4 * hid, cin + hid, 3, 3), jnp.float32, -bound, bound)
        b = jax.random.uniform(k2, (4 * hid,), jnp.float32, -bound, bound)
        params.append((w, b))
        cin = hid
    return params


# ---------------------------------------------------------------------------
# Pure-JAX reference (lax.conv) for numerical verification
# ---------------------------------------------------------------------------
@jax.jit
def reference_forward(X, params):
    cur = X.astype(jnp.float32)
    B, T = cur.shape[0], cur.shape[1]
    for (w, b) in params:
        hid = w.shape[0] // 4
        H, W = cur.shape[3], cur.shape[4]
        h = jnp.zeros((B, hid, H, W), jnp.float32)
        c = jnp.zeros((B, hid, H, W), jnp.float32)
        outs = []
        for t in range(T):
            comb = jnp.concatenate([cur[:, t], h], axis=1)
            gates = lax.conv_general_dilated(
                comb, w, (1, 1), ((1, 1), (1, 1)),
                dimension_numbers=("NCHW", "OIHW", "NCHW"),
            ) + b[None, :, None, None]
            i = jax.nn.sigmoid(gates[:, :hid])
            f = jax.nn.sigmoid(gates[:, hid:2 * hid])
            o = jax.nn.sigmoid(gates[:, 2 * hid:3 * hid])
            g = jnp.tanh(gates[:, 3 * hid:])
            c = f * c + i * g
            h = o * jnp.tanh(c)
            outs.append(h)
        cur = jnp.stack(outs, axis=1)
    return cur


if __name__ == "__main__":
    B, T, H, W = 2, 8, 8, 8            # X: [batch, timestep, channel=1, H, W]; B*H*W = 128 lanes
    inner_dims = [32, 16]              # ConvLSTM hidden dims (num_layers = 2)

    key = jax.random.PRNGKey(0)
    k_x, k_p = jax.random.split(key)
    X = jax.random.normal(k_x, (B, T, 1, H, W), jnp.float32)
    params = init_params(k_p, 1, inner_dims)

    roll_sign = -1 if _roll_matches_jnp_roll() else 1
    forward = make_forward(H, W, roll_sign)

    out = jax.block_until_ready(forward(X, params))
    assert out.shape == (B, T, inner_dims[-1], H, W), out.shape
    assert bool(jnp.all(jnp.isfinite(out)))

    # Verify against the pure-JAX ConvLSTM reference (loose tol for MXU precision).
    ref = jax.block_until_ready(reference_forward(X, params))
    np.testing.assert_allclose(np.asarray(out), np.asarray(ref), rtol=5e-2, atol=5e-2)

    print("KERNEL_OK")
</pallas_src>

<mosaic_0001>
module attributes {stable_mosaic.version = 11 : i64} {
  func.func @k(%arg0: memref<8x128xf32, #tpu.memory_space<vmem>>, %arg1: memref<8x128xf32, #tpu.memory_space<vmem>>) attributes {dimension_semantics = [], scalar_prefetch = 0 : i64, scratch_operands = 0 : i64, tpu.core_type = #tpu.core_type<tc>} {
    %c0 = arith.constant 0 : index
    %c0_0 = arith.constant 0 : index
    %0 = vector.load %arg0[%c0, %c0_0] : memref<8x128xf32, #tpu.memory_space<vmem>>, vector<8x128xf32>
    %c1_i32 = arith.constant 1 : i32
    %1 = tpu.dynamic_rotate %0 by %c1_i32 dim 1 : vector<8x128xf32>, i32 -> vector<8x128xf32>
    %c0_1 = arith.constant 0 : index
    %c0_2 = arith.constant 0 : index
    %2 = vector.load %arg1[%c0_1, %c0_2] : memref<8x128xf32, #tpu.memory_space<vmem>>, vector<8x128xf32>
    tpu.vector_store %arg1[%c0_1, %c0_2], %1 {strides = array<i32>} : memref<8x128xf32, #tpu.memory_space<vmem>>, vector<8x128xf32>,
    return
  }
}

</mosaic_0001>

<bundles_post_ra>
// kernel: tpu_custom_call.1
= control target key start
LH: loop header
LB: loop body
LE: loop exit
PB: predicated region body
PF: predicated region fallthrough
CT: control target
= control target key end

     0   :  { %6 = vsyncpa [#allocation3], 0  ;;  %s106_s0 = inlined_call_operand.hbm [shape: f32[8,128], index: 0, kind: input, shape index: {}]   ;;  %s107_s1 = inlined_call_operand.hbm [shape: f32[8,128], index: 1, kind: output, shape index: {}]  }
   0x1   :  { %7 = vsyncpa [#allocation4], 0  ;;  %s87_s6 = smov [#allocation2]  }
   0x2   :  { %s14_s7 = sshll.u32 %s87_s6, 4  ;;  %s15_s7 = int_to_ptr.vmem [resolvable:$true] %s14_s7 }
   0x3   :  { %s51_s8 = scalar_lea.vmem %s15_s7, 128  ;;  %p56_p1 = scmp.lt.s32.totalorder %s15_s7, %s15_s7 }
   0x4   :  { %p52_p0 = scmp.ne.s32.totalorder %s15_s7, %s51_s8  ;;  %p57_p2 = scmp.lt.s32.totalorder %s51_s8, %s51_s8 }
   0x6   :  { %p58_p3 = por %p57_p2, %p56_p1 }
   0x8   :  { %p59_p4 = pnand %p58_p3, %p52_p0 }
   0xa   :  { %62 = shalt.err (!%p59_p4)
}
   0xb   :  { %17 = dma.hbm_to_vmem [thread:$0]  %s106_s0, 128, %s15_s7, [#allocation3]  }
   0xc   :  { %83 = dma.done.wait [#allocation3], 128  }
   0xd   :  { %84 = vsyncadd [#allocation3], 4294967168  ;;  %v21_v0 = vld [vmem:[#allocation2] sm:$0xff]  ;;  %s88_s11 = smov 1   ;;  %s89_s12 = smov [#allocation5]  }
   0xe   :  { %22 = vrot.lane.b32.xlu0 %v21_v0, %s88_s11  ;;  %s31_s13 = sshll.u32 %s89_s12, 4  ;;  %s32_s13 = int_to_ptr.vmem [resolvable:$true] %s31_s13 }
   0xf   :  { %s63_s14 = scalar_lea.vmem %s32_s13, 128  ;;  %p68_p6 = scmp.lt.s32.totalorder %s32_s13, %s32_s13 }
  0x10   :  { %p64_p5 = scmp.ne.s32.totalorder %s32_s13, %s63_s14  ;;  %p69_p7 = scmp.lt.s32.totalorder %s63_s14, %s63_s14 }
  0x12   :  { %p70_p8 = por %p69_p7, %p68_p6 }
  0x14   :  { %p71_p9 = pnand %p70_p8, %p64_p5 }
  0x80   :  { %v23_v1 = vpop.permute.xlu0 %22 }
  0x81   :  { %24 = vst [vmem:[#allocation5] sm:$0xff] %v23_v1 }
  0x82   :  { %74 = shalt.err (!%p71_p9)
}
  0x83   :  { %34 = dma.vmem_to_hbm [thread:$0]  %s32_s13, 128, %s107_s1, [#allocation4]  }
  0x84   :  { %85 = dma.done.wait [#allocation4], 128  }
  0x85   :  { %86 = vsyncadd [#allocation4], 4294967168 }
  0x86   :  { %38 = vsyncpa [#allocation3], 1 }
  0x87   :  { %39 = vsyncpa [#allocation4], 1 }

</bundles_post_ra>
